<compile_context>
chip_gen: v7x
topology: tpu7x:2x2x1
jax: 0.10.0
libtpu: 0.0.40
codegen_flags: <defaults>
</compile_context>

<pallas_src>
import math
import functools

import jax
import jax.numpy as jnp
from jax.experimental import pallas as pl
from jax.experimental.pallas import tpu as pltpu


def build_pe_table(d_model: int, max_len: int) -> jnp.ndarray:
    """Sinusoidal positional-encoding table, shape (max_len, d_model)."""
    position = jnp.arange(0, max_len, dtype=jnp.float32)[:, None]           # (max_len, 1)
    div_term = jnp.exp(
        jnp.arange(0, d_model, 2, dtype=jnp.float32) * (-math.log(10000.0) / d_model)
    )                                                                        # (d_model/2,)
    angles = position * div_term                                             # (max_len, d_model/2)
    pe = jnp.zeros((max_len, d_model), dtype=jnp.float32)
    pe = pe.at[:, 0::2].set(jnp.sin(angles))
    pe = pe.at[:, 1::2].set(jnp.cos(angles))
    return pe


# ---------------------------------------------------------------------------
# Kernels
# ---------------------------------------------------------------------------
def _pe_add_eval_kernel(x_ref, pe_ref, o_ref):
    # x_ref/o_ref: (TB, L, D), pe_ref: (L, D) -- PE tile stays resident in VMEM.
    o_ref[...] = x_ref[...] + pe_ref[...][None, :, :]


def _pe_add_dropout_kernel(x_ref, pe_ref, bits_ref, o_ref, *, threshold, scale):
    # Inverted dropout via exact integer threshold: keep iff bits >= p * 2^32.
    y = x_ref[...] + pe_ref[...][None, :, :]
    keep = bits_ref[...] >= jnp.uint32(threshold)
    o_ref[...] = jnp.where(keep, y * jnp.float32(scale), jnp.zeros_like(y))


# ---------------------------------------------------------------------------
# Wrapper
# ---------------------------------------------------------------------------
def _choose_batch_tile(B: int, L: int, D: int, target_bytes: int = 4 << 20) -> int:
    """Largest divisor of B whose (TB, L, D) f32 block is <= target_bytes.

    Sized conservatively for v7x's smaller VMEM (64 MiB physical / 32 MiB
    scoped default): 3 double-buffered arrays * 4 MiB each stays well inside.
    """
    per_elem = L * D * 4
    tb = max(1, min(B, target_bytes // max(per_elem, 1)))
    while B % tb != 0:
        tb -= 1
    return tb


def positional_encoding_forward(x, pe_table, *, p=0.3, training=False, rng=None):
    """x: (B, L, D) float32.  pe_table: (max_len, D) float32 with max_len >= L."""
    B, L, D = x.shape
    TB = _choose_batch_tile(B, L, D)
    grid = (B // TB,)

    x_spec = pl.BlockSpec((TB, L, D), lambda b: (b, 0, 0))
    # PE block index is constant across the batch axis -> never re-DMA'd.
    pe_spec = pl.BlockSpec((L, D), lambda b: (0, 0))
    out_spec = pl.BlockSpec((TB, L, D), lambda b: (b, 0, 0))
    out_shape = jax.ShapeDtypeStruct((B, L, D), x.dtype)
    compiler_params = pltpu.CompilerParams(dimension_semantics=("parallel",))

    n_elems = B * L * D

    if not training or p <= 0.0:
        return pl.pallas_call(
            _pe_add_eval_kernel,
            out_shape=out_shape,
            grid_spec=pltpu.PrefetchScalarGridSpec(
                num_scalar_prefetch=0,
                grid=grid,
                in_specs=[x_spec, pe_spec],
                out_specs=out_spec,
            ),
            compiler_params=compiler_params,
            cost_estimate=pl.CostEstimate(
                flops=n_elems, transcendentals=0, bytes_accessed=3 * n_elems * 4
            ),
        )(x, pe_table)

    if rng is None:
        rng = jax.random.PRNGKey(0)
    # Random bits generated host-side (robust under CPU interpret); dropout
    # decision is an exact uint32 threshold compare inside the kernel.
    bits = jax.random.bits(rng, (B, L, D), dtype=jnp.uint32)
    threshold = min(int(round(p * (1 << 32))), (1 << 32) - 1)
    scale = 1.0 / (1.0 - p)

    kernel = functools.partial(_pe_add_dropout_kernel, threshold=threshold, scale=scale)
    bits_spec = pl.BlockSpec((TB, L, D), lambda b: (b, 0, 0))

    return pl.pallas_call(
        kernel,
        out_shape=out_shape,
        grid_spec=pltpu.PrefetchScalarGridSpec(
            num_scalar_prefetch=0,
            grid=grid,
            in_specs=[x_spec, pe_spec, bits_spec],
            out_specs=out_spec,
        ),
        compiler_params=compiler_params,
        cost_estimate=pl.CostEstimate(
            flops=3 * n_elems, transcendentals=0, bytes_accessed=4 * n_elems * 4
        ),
    )(x, pe_table, bits)


if __name__ == "__main__":
    d_model = 128
    dropout_p = 0.3
    max_len = 64            # small max_len for the synthetic test (module default 5000)
    batch, seq = 2, 8

    key = jax.random.PRNGKey(0)
    x_key, drop_key = jax.random.split(key)
    x = jax.random.normal(x_key, (batch, seq, d_model), dtype=jnp.float32)

    pe_table = build_pe_table(d_model, max_len)

    # Eval-mode forward (dropout is identity), checked against pure-JAX reference.
    out = positional_encoding_forward(x, pe_table, p=dropout_p, training=False)
    out = jax.block_until_ready(out)
    ref = x + pe_table[None, :seq, :]
    assert out.shape == x.shape and out.dtype == x.dtype
    assert jnp.allclose(out, ref, atol=1e-6), "eval-mode mismatch vs reference"

    # Training-mode forward (inverted dropout with integer-threshold mask),
    # checked against a pure-JAX reference built from the same random bits.
    out_train = positional_encoding_forward(
        x, pe_table, p=dropout_p, training=True, rng=drop_key
    )
    out_train = jax.block_until_ready(out_train)
    bits = jax.random.bits(drop_key, (batch, seq, d_model), dtype=jnp.uint32)
    thr = jnp.uint32(min(int(round(dropout_p * (1 << 32))), (1 << 32) - 1))
    keep = bits >= thr
    ref_train = jnp.where(keep, ref * (1.0 / (1.0 - dropout_p)), 0.0)
    assert out_train.shape == x.shape
    assert jnp.allclose(out_train, ref_train, atol=1e-6), "train-mode mismatch vs reference"

    print("KERNEL_OK")
</pallas_src>

<mosaic_0001>
module attributes {stable_mosaic.version = 11 : i64} {
  func.func @_pe_add_eval_kernel(%arg0: i32, %arg1: memref<2x8x128xf32, #tpu.memory_space<vmem>>, %arg2: memref<8x128xf32, #tpu.memory_space<vmem>>, %arg3: memref<2x8x128xf32, #tpu.memory_space<vmem>>) attributes {dimension_semantics = [#tpu.dimension_semantics<parallel>], iteration_bounds = array<i64: 1>, scalar_prefetch = 0 : i64, scratch_operands = 0 : i64, tpu.core_type = #tpu.core_type<tc>, window_params = [{transform_indices = @transform_0, window_bounds = array<i64: 2, 8, 128>}, {transform_indices = @transform_1, window_bounds = array<i64: 8, 128>}, {transform_indices = @transform_2, window_bounds = array<i64: 2, 8, 128>}]} {
    %c0 = arith.constant 0 : index
    %c0_0 = arith.constant 0 : index
    %c0_1 = arith.constant 0 : index
    %0 = vector.load %arg1[%c0, %c0_0, %c0_1] : memref<2x8x128xf32, #tpu.memory_space<vmem>>, vector<2x8x128xf32>
    %c0_2 = arith.constant 0 : index
    %c0_3 = arith.constant 0 : index
    %1 = vector.load %arg2[%c0_2, %c0_3] : memref<8x128xf32, #tpu.memory_space<vmem>>, vector<8x128xf32>
    %2 = vector.shape_cast %1 : vector<8x128xf32> to vector<1x8x128xf32>
    %3 = vector.broadcast %2 : vector<1x8x128xf32> to vector<2x8x128xf32>
    %4 = arith.addf %0, %3 : vector<2x8x128xf32>
    %c0_4 = arith.constant 0 : index
    %c0_5 = arith.constant 0 : index
    %c0_6 = arith.constant 0 : index
    %5 = vector.load %arg3[%c0_4, %c0_5, %c0_6] : memref<2x8x128xf32, #tpu.memory_space<vmem>>, vector<2x8x128xf32>
    tpu.vector_store %arg3[%c0_4, %c0_5, %c0_6], %4 {strides = array<i32>} : memref<2x8x128xf32, #tpu.memory_space<vmem>>, vector<2x8x128xf32>,
    return
  }
  func.func @transform_0(%arg0: i32) -> (i32, i32, i32) {
    %c0_i32 = arith.constant 0 : i32
    %c0_i32_0 = arith.constant 0 : i32
    %c0_i32_1 = arith.constant 0 : i32
    return %arg0, %c0_i32, %c0_i32_0 : i32, i32, i32
  }
  func.func @transform_1(%arg0: i32) -> (i32, i32) {
    %c0_i32 = arith.constant 0 : i32
    %c0_i32_0 = arith.constant 0 : i32
    %c0_i32_1 = arith.constant 0 : i32
    return %c0_i32, %c0_i32_0 : i32, i32
  }
  func.func @transform_2(%arg0: i32) -> (i32, i32, i32) {
    %c0_i32 = arith.constant 0 : i32
    %c0_i32_0 = arith.constant 0 : i32
    %c0_i32_1 = arith.constant 0 : i32
    return %arg0, %c0_i32, %c0_i32_0 : i32, i32, i32
  }
}

</mosaic_0001>

<bundles_post_ra>
// kernel: tpu_custom_call.1
= control target key start
LH: loop header
LB: loop body
LE: loop exit
PB: predicated region body
PF: predicated region fallthrough
CT: control target
= control target key end

     0   :  { %7 = vsyncpa [#allocation3], 0  ;;  %s205_s0 = inlined_call_operand.hbm [shape: f32[2,8,128], index: 0, kind: input, shape index: {}]   ;;  %s206_s1 = inlined_call_operand.hbm [shape: f32[64,128], index: 1, kind: input, shape index: {}]   ;;  %s207_s2 = inlined_call_operand.hbm [shape: f32[2,8,128], index: 2, kind: output, shape index: {}]  }
   0x1   :  { %8 = vsyncpa [#allocation6], 0 }
   0x2   :  { %9 = vsyncpa [#allocation4], 0  ;;  %s140_s9 = smov [#allocation2]   ;;  %s68_s13 = scalar_lea.hbm %s205_s0, 256 }
   0x3   :  { %s15_s10 = sshll.u32 %s140_s9, 4  ;;  %p69_p0 = scmp.ne.s32.totalorder %s205_s0, %s68_s13  ;;  %s16_s10 = int_to_ptr.vmem [resolvable:$true] %s15_s10 }
   0x4   :  { %p72_p1 = scmp.lt.u32.totalorder %s68_s13, %s205_s0 }
   0x6   :  { %p74_p2 = pnand %p72_p1, %p69_p0 }
   0x8   :  { %77 = shalt.err (!%p74_p2)
}
   0x9   :  { %s78_s18 = scalar_lea.vmem %s16_s10, 256  ;;  %p83_p4 = scmp.lt.s32.totalorder %s16_s10, %s16_s10 }
   0xa   :  { %p79_p3 = scmp.ne.s32.totalorder %s16_s10, %s78_s18  ;;  %p84_p5 = scmp.lt.s32.totalorder %s78_s18, %s78_s18 }
   0xc   :  { %p85_p6 = por %p84_p5, %p83_p4 }
   0xe   :  { %p86_p7 = pnand %p85_p6, %p79_p3 }
  0x10   :  { %89 = shalt.err (!%p86_p7)
}
  0x11   :  { %s141_s19 = smov 128   ;;  %s142_s20 = smov 8  }
  0x12   :  { %21 = dma.hbm_to_vmem [thread:$0]  %s205_s0, 256, %s16_s10, [#allocation3], %s141_s19, %s141_s19, %s142_s20  }
  0x13   :  { %s143_s23 = smov [#allocation5]   ;;  %s90_s27 = scalar_lea.hbm %s206_s1, 128 }
  0x14   :  { %s28_s24 = sshll.u32 %s143_s23, 4  ;;  %p91_p8 = scmp.ne.s32.totalorder %s206_s1, %s90_s27  ;;  %s29_s24 = int_to_ptr.vmem [resolvable:$true] %s28_s24 }
  0x15   :  { %s92_s4 = scalar_lea.hbm %s206_s1, 1024  ;;  %p94_p10 = scmp.lt.u32.totalorder %s90_s27, %s206_s1 }
  0x16   :  { %p93_p9 = scmp.lt.u32.totalorder %s92_s4, %s90_s27 }
  0x18   :  { %p95_p11 = por %p94_p10, %p93_p9 }
  0x1a   :  { %p96_p12 = pnand %p95_p11, %p91_p8 }
  0x1c   :  { %99 = shalt.err (!%p96_p12)
}
  0x1d   :  { %s100_s0 = scalar_lea.vmem %s29_s24, 128  ;;  %p105_p0 = scmp.lt.s32.totalorder %s29_s24, %s29_s24 }
  0x1e   :  { %p101_p13 = scmp.ne.s32.totalorder %s29_s24, %s100_s0  ;;  %p106_p1 = scmp.lt.s32.totalorder %s100_s0, %s100_s0 }
  0x20   :  { %p107_p2 = por %p106_p1, %p105_p0 }
  0x22   :  { %p108_p3 = pnand %p107_p2, %p101_p13 }
  0x24   :  { %111 = shalt.err (!%p108_p3)
}
  0x25   :  { %31 = dma.hbm_to_vmem [thread:$0]  %s206_s1, 128, %s29_s24, [#allocation6]  }
  0x26   :  { %134 = dma.done.wait [#allocation3], 256  }
  0x27   :  { %135 = vsyncadd [#allocation3], 4294967040 }
  0x28   :  { %136 = dma.done.wait [#allocation6], 128  }
  0x29   :  { %137 = vsyncadd [#allocation6], 4294967168  ;;  %s144_s9 = smov [#allocation7]   ;;  %v38_v0 = vld [vmem:[#allocation2] sm:$0xff]  ;;  %v40_v1 = vld [vmem:[#allocation5] sm:$0xff] }
  0x2a   :  { %s50_s10 = sshll.u32 %s144_s9, 4  ;;  %v39_v2 = vld [vmem:[#allocation2 + $0x8] sm:$0xff]  ;;  %v41_v3 = vadd.f32 %v40_v1, %v38_v0  ;;  %s51_s10 = int_to_ptr.vmem [resolvable:$true] %s50_s10 }
  0x2b   :  { %v42_v4 = vadd.f32 %v40_v1, %v39_v2  ;;  %s112_s11 = scalar_lea.vmem %s51_s10, 256  ;;  %p117_p5 = scmp.lt.s32.totalorder %s51_s10, %s51_s10 }
  0x2c   :  { %43 = vst [vmem:[#allocation7] sm:$0xff] %v41_v3  ;;  %p113_p4 = scmp.ne.s32.totalorder %s51_s10, %s112_s11  ;;  %p118_p6 = scmp.lt.s32.totalorder %s112_s11, %s112_s11 }
  0x2d   :  { %44 = vst [vmem:[#allocation7 + $0x8] sm:$0xff] %v42_v4 }
  0x2e   :  { %p119_p7 = por %p118_p6, %p117_p5 }
  0x30   :  { %p120_p8 = pnand %p119_p7, %p113_p4 }
  0x32   :  { %123 = shalt.err (!%p120_p8)
}
  0x33   :  { %s124_s13 = scalar_lea.hbm %s207_s2, 256 }
  0x34   :  { %p125_p9 = scmp.ne.s32.totalorder %s207_s2, %s124_s13  ;;  %p128_p10 = scmp.lt.u32.totalorder %s124_s13, %s207_s2 }
  0x36   :  { %p130_p11 = pnand %p128_p10, %p125_p9 }
  0x38   :  { %133 = shalt.err (!%p130_p11)
}
  0x39   :  { %56 = dma.vmem_to_hbm [thread:$0]  %s51_s10, 256, %s207_s2, [#allocation4], %s141_s19, %s141_s19, %s142_s20  }
  0x3a   :  { %138 = dma.done.wait [#allocation4], 256  }
  0x3b   :  { %139 = vsyncadd [#allocation4], 4294967040 }
  0x3c   :  { %60 = vsyncpa [#allocation3], 1 }
  0x3d   :  { %61 = vsyncpa [#allocation6], 1 }
  0x3e   :  { %62 = vsyncpa [#allocation4], 1 }

</bundles_post_ra>
